<compile_context>
chip_gen: v7x
topology: tpu7x:2x2x1
jax: 0.10.0
libtpu: 0.0.40
codegen_flags: <defaults>
</compile_context>

<pallas_src>
import jax
import jax.numpy as jnp
from jax.experimental import pallas as pl
from jax.experimental.pallas import tpu as pltpu


def _relu_kernel(x_ref, o_ref):
    # One VPU max per vreg against a scalar zero (no broadcast materialization).
    o_ref[...] = jnp.maximum(x_ref[...], 0)


def _round_up(n: int, m: int) -> int:
    return ((n + m - 1) // m) * m


def audionet_forward(x: jax.Array) -> jax.Array:
    """Pallas implementation of AudioNet.forward: y = relu(x), same shape/dtype."""
    orig_shape = x.shape
    dtype = x.dtype
    n = x.size
    if n == 0:
        return x

    itemsize = jnp.dtype(dtype).itemsize
    # Lane-dense layout: last dim is a large multiple of 128.
    LANE = 512
    # Sublane granularity: 8 for 4-byte, 16 for 2-byte, 32 for 1-byte dtypes.
    sub = max(8, 32 // itemsize)

    rows = pl.cdiv(n, LANE)
    # ~2 MiB per block, rounded down to the sublane multiple (>= one sublane).
    target_rows = max(sub, ((2 << 20) // (LANE * itemsize)) // sub * sub)
    block_rows = min(target_rows, _round_up(rows, sub))
    rows_padded = _round_up(rows, block_rows)
    grid = (rows_padded // block_rows,)

    # Flatten; pad the tail only if needed so the block shape tiles exactly.
    x_flat = x.reshape(-1)
    pad = rows_padded * LANE - n
    if pad:
        x_flat = jnp.pad(x_flat, (0, pad))
    x2d = x_flat.reshape(rows_padded, LANE)

    out2d = pl.pallas_call(
        _relu_kernel,
        out_shape=jax.ShapeDtypeStruct((rows_padded, LANE), dtype),
        grid=grid,
        in_specs=[pl.BlockSpec((block_rows, LANE), lambda i: (i, 0))],
        out_specs=pl.BlockSpec((block_rows, LANE), lambda i: (i, 0)),
        compiler_params=pltpu.CompilerParams(
            dimension_semantics=("parallel",),
        ),
    )(x2d)

    if pad:
        return out2d.reshape(-1)[:n].reshape(orig_shape)
    return out2d.reshape(orig_shape)


if __name__ == "__main__":
    key = jax.random.PRNGKey(0)
    k0, k1 = jax.random.split(key)

    # Small NCHW-style input consistent with the module: (B=2, C=4, H=16, W=16).
    x = jax.random.normal(k0, (2, 4, 16, 16), dtype=jnp.float32)
    y = jax.block_until_ready(audionet_forward(x))
    y_ref = jnp.maximum(x, 0.0)
    assert y.shape == x.shape and y.dtype == x.dtype
    assert bool(jnp.allclose(y, y_ref)), "mismatch vs reference ReLU"

    # Secondary check: odd shape that exercises the tail-padding / slice path.
    x2 = jax.random.normal(k1, (3, 5, 17, 19), dtype=jnp.float32)
    y2 = jax.block_until_ready(audionet_forward(x2))
    assert y2.shape == x2.shape and y2.dtype == x2.dtype
    assert bool(jnp.allclose(y2, jnp.maximum(x2, 0.0))), "mismatch on padded path"

    print("KERNEL_OK")
</pallas_src>

<mosaic_0001>
module attributes {stable_mosaic.version = 11 : i64} {
  func.func @_relu_kernel(%arg0: i32, %arg1: memref<8x512xf32, #tpu.memory_space<vmem>>, %arg2: memref<8x512xf32, #tpu.memory_space<vmem>>) attributes {dimension_semantics = [#tpu.dimension_semantics<parallel>], iteration_bounds = array<i64: 1>, scalar_prefetch = 0 : i64, scratch_operands = 0 : i64, tpu.core_type = #tpu.core_type<tc>, window_params = [{transform_indices = @transform_0, window_bounds = array<i64: 8, 512>}, {transform_indices = @transform_1, window_bounds = array<i64: 8, 512>}]} {
    %c0 = arith.constant 0 : index
    %c0_0 = arith.constant 0 : index
    %0 = vector.load %arg1[%c0, %c0_0] : memref<8x512xf32, #tpu.memory_space<vmem>>, vector<8x512xf32>
    %cst = arith.constant 0.000000e+00 : f32
    %1 = vector.broadcast %cst : f32 to vector<8x512xf32>
    %2 = arith.maximumf %0, %1 : vector<8x512xf32>
    %c0_1 = arith.constant 0 : index
    %c0_2 = arith.constant 0 : index
    %3 = vector.load %arg2[%c0_1, %c0_2] : memref<8x512xf32, #tpu.memory_space<vmem>>, vector<8x512xf32>
    tpu.vector_store %arg2[%c0_1, %c0_2], %2 {strides = array<i32>} : memref<8x512xf32, #tpu.memory_space<vmem>>, vector<8x512xf32>,
    return
  }
  func.func @transform_0(%arg0: i32) -> (i32, i32) {
    %c0_i32 = arith.constant 0 : i32
    %c0_i32_0 = arith.constant 0 : i32
    return %arg0, %c0_i32 : i32, i32
  }
  func.func @transform_1(%arg0: i32) -> (i32, i32) {
    %c0_i32 = arith.constant 0 : i32
    %c0_i32_0 = arith.constant 0 : i32
    return %arg0, %c0_i32 : i32, i32
  }
}

</mosaic_0001>

<bundles_post_ra>
// kernel: tpu_custom_call.1
= control target key start
LH: loop header
LB: loop body
LE: loop exit
PB: predicated region body
PF: predicated region fallthrough
CT: control target
= control target key end

     0   :  { %6 = vsyncpa [#allocation3], 0  ;;  %s134_s0 = inlined_call_operand.hbm [shape: f32[8,512], index: 0, kind: input, shape index: {}]   ;;  %s135_s1 = inlined_call_operand.hbm [shape: f32[8,512], index: 1, kind: output, shape index: {}]  }
   0x1   :  { %7 = vsyncpa [#allocation4], 0  ;;  %s98_s6 = smov [#allocation2]   ;;  %s50_s10 = scalar_lea.hbm %s134_s0, 512 }
   0x2   :  { %s14_s7 = sshll.u32 %s98_s6, 4  ;;  %p51_p0 = scmp.ne.s32.totalorder %s134_s0, %s50_s10  ;;  %s15_s7 = int_to_ptr.vmem [resolvable:$true] %s14_s7 }
   0x3   :  { %p54_p1 = scmp.lt.u32.totalorder %s50_s10, %s134_s0 }
   0x5   :  { %p56_p2 = pnand %p54_p1, %p51_p0 }
   0x7   :  { %59 = shalt.err (!%p56_p2)
}
   0x8   :  { %s60_s15 = scalar_lea.vmem %s15_s7, 512  ;;  %p65_p4 = scmp.lt.s32.totalorder %s15_s7, %s15_s7 }
   0x9   :  { %p61_p3 = scmp.ne.s32.totalorder %s15_s7, %s60_s15  ;;  %p66_p5 = scmp.lt.s32.totalorder %s60_s15, %s60_s15 }
   0xb   :  { %p67_p6 = por %p66_p5, %p65_p4 }
   0xd   :  { %p68_p7 = pnand %p67_p6, %p61_p3 }
   0xf   :  { %71 = shalt.err (!%p68_p7)
}
  0x10   :  { %17 = dma.hbm_to_vmem [thread:$0]  %s134_s0, 512, %s15_s7, [#allocation3]  }
  0x11   :  { %94 = dma.done.wait [#allocation3], 512  }
  0x12   :  { %95 = vsyncadd [#allocation3], 4294966784  ;;  %s99_s18 = smov [#allocation5]   ;;  %v21_v0 = vld [vmem:[#allocation2] sm:$0xff]  ;;  %v22_v1 = vld [vmem:[#allocation2 + $0x8] sm:$0xff] }
  0x13   :  { %s39_s19 = sshll.u32 %s99_s18, 4  ;;  %v23_v2 = vld [vmem:[#allocation2 + $0x10] sm:$0xff]  ;;  %v25_v3 = vmax.f32 %v21_v0, 0.0  ;;  %v26_v4 = vmax.f32 %v22_v1, 0.0  ;;  %v24_v6 = vld [vmem:[#allocation2 + $0x18] sm:$0xff]  ;;  %s40_s19 = int_to_ptr.vmem [resolvable:$true] %s39_s19 }
  0x14   :  { %v27_v5 = vmax.f32 %v23_v2, 0.0  ;;  %v28_v7 = vmax.f32 %v24_v6, 0.0  ;;  %s72_s20 = scalar_lea.vmem %s40_s19, 512  ;;  %p77_p9 = scmp.lt.s32.totalorder %s40_s19, %s40_s19 }
  0x15   :  { %29 = vst [vmem:[#allocation5] sm:$0xff] %v25_v3  ;;  %30 = vst [vmem:[#allocation5 + $0x8] sm:$0xff] %v26_v4  ;;  %p73_p8 = scmp.ne.s32.totalorder %s40_s19, %s72_s20  ;;  %p78_p10 = scmp.lt.s32.totalorder %s72_s20, %s72_s20 }
  0x16   :  { %31 = vst [vmem:[#allocation5 + $0x10] sm:$0xff] %v27_v5  ;;  %32 = vst [vmem:[#allocation5 + $0x18] sm:$0xff] %v28_v7 }
  0x17   :  { %p79_p11 = por %p78_p10, %p77_p9 }
  0x19   :  { %p80_p12 = pnand %p79_p11, %p73_p8 }
  0x1b   :  { %83 = shalt.err (!%p80_p12)
}
  0x1c   :  { %s84_s22 = scalar_lea.hbm %s135_s1, 512 }
  0x1d   :  { %p85_p13 = scmp.ne.s32.totalorder %s135_s1, %s84_s22  ;;  %p88_p0 = scmp.lt.u32.totalorder %s84_s22, %s135_s1 }
  0x1f   :  { %p90_p1 = pnand %p88_p0, %p85_p13 }
  0x21   :  { %93 = shalt.err (!%p90_p1)
}
  0x22   :  { %42 = dma.vmem_to_hbm [thread:$0]  %s40_s19, 512, %s135_s1, [#allocation4]  }
  0x23   :  { %96 = dma.done.wait [#allocation4], 512  }
  0x24   :  { %97 = vsyncadd [#allocation4], 4294966784 }
  0x25   :  { %46 = vsyncpa [#allocation3], 1 }
  0x26   :  { %47 = vsyncpa [#allocation4], 1 }

</bundles_post_ra>
